<compile_context>
chip_gen: v7x
topology: tpu7x:2x2x1
jax: 0.10.0
libtpu: 0.0.40
codegen_flags: <defaults>
</compile_context>

<pallas_src>
import math
import jax
import jax.numpy as jnp
from jax.experimental import pallas as pl
from jax.experimental.pallas import tpu as pltpu


def _disc_kernel(x_ref, w_ref, b_ref, o_ref):
    # x_ref: (G, 128, N) VMEM -- G*128 = TILE_B batch rows (batch on sublane-group x lane)
    # w_ref: (1, N)      VMEM -- grid-invariant weight row
    # b_ref: (1,)        SMEM -- scalar bias
    # o_ref: (G, 128)    VMEM -- lane-dense output slab
    x = x_ref[...].astype(jnp.float32)
    w = w_ref[...].astype(jnp.float32)            # (1, N) broadcasts over (G, 128, N)
    y = jnp.sum(x * w, axis=-1) + b_ref[0]        # VPU mul + XLU lane reduce -> (G, 128)
    # sigmoid: exp goes to the EUP slot; exact reciprocal/divide keeps full accuracy.
    o_ref[...] = (1.0 / (1.0 + jnp.exp(-y))).astype(o_ref.dtype)


def _round_up(x, m):
    return (x + m - 1) // m * m


def discrimiter2_forward(x, w, b, *, tile_b=4096):
    """sigmoid(x @ w.T + b).  x: (B, N), w: (1, N), b: (1,) -> (B, 1)."""
    B, N = x.shape
    assert w.shape == (1, N) and b.shape == (1,)

    # Pad B so the batch maps cleanly onto 128-wide lanes and whole tiles.
    if B <= tile_b:
        tb = _round_up(B, 128)          # single grid step; block == full (padded) array
    else:
        tb = tile_b                     # tile_b % 1024 == 0 -> per-tile sublane groups % 8 == 0
    b_pad = _round_up(B, tb)
    if b_pad != B:
        x = jnp.pad(x, ((0, b_pad - B), (0, 0)))   # zero rows -> garbage outputs sliced off

    g_tile = tb // 128                  # sublane-groups per tile
    num_tiles = b_pad // tb
    x3 = x.reshape(b_pad // 128, 128, N)            # free row-major metadata reshape

    out = pl.pallas_call(
        _disc_kernel,
        out_shape=jax.ShapeDtypeStruct((b_pad // 128, 128), jnp.float32),
        grid=(num_tiles,),
        in_specs=[
            pl.BlockSpec((g_tile, 128, N), lambda i: (i, 0, 0)),   # x tile (pipelined)
            pl.BlockSpec((1, N), lambda i: (0, 0)),                # weight, grid-invariant
            pl.BlockSpec(memory_space=pltpu.MemorySpace.SMEM),     # bias scalar in SMEM
        ],
        out_specs=pl.BlockSpec((g_tile, 128), lambda i: (i, 0)),   # lane-dense output slab
        compiler_params=pltpu.CompilerParams(
            dimension_semantics=("parallel",),    # shard batch tiles across TCs (v7x)
        ),
    )(x3, w, b)

    # Layout plumbing back to PyTorch's (B, 1) output.
    return out.reshape(b_pad, 1)[:B]


def init_params(key, n_latents=200):
    # torch.nn.init.xavier_uniform_ on weight (1, n_latents): bound = sqrt(6/(fan_in+fan_out))
    bound = math.sqrt(6.0 / (n_latents + 1))
    w = jax.random.uniform(key, (1, n_latents), jnp.float32, -bound, bound)
    b = jnp.zeros((1,), jnp.float32)    # constant_(bias, 0.0)
    return w, b


def _reference(x, w, b):
    # Same math as torch.sigmoid(fc1(x)), computed without an (ambiguous-precision)
    # TPU matmul so the comparison is apples-to-apples in f32.
    z = jnp.sum(x * w, axis=-1, keepdims=True) + b
    return jax.nn.sigmoid(z)


if __name__ == "__main__":
    n_latents = 200
    key = jax.random.PRNGKey(0)
    k_w, k_x1, k_x2 = jax.random.split(key, 3)

    w, b = init_params(k_w, n_latents)

    # Small, module-sized check (batch=8, n_latents=200); exercises the padding path.
    x_small = jax.random.normal(k_x1, (8, n_latents), jnp.float32)
    out_small = jax.block_until_ready(discrimiter2_forward(x_small, w, b))
    assert out_small.shape == (8, 1)
    assert jnp.allclose(out_small, _reference(x_small, w, b), atol=1e-5, rtol=1e-5)

    # Larger batch exercises the gridded, double-buffered, parallel path (2 tiles).
    x_big = jax.random.normal(k_x2, (8192, n_latents), jnp.float32)
    out_big = jax.block_until_ready(discrimiter2_forward(x_big, w, b))
    assert out_big.shape == (8192, 1)
    assert jnp.allclose(out_big, _reference(x_big, w, b), atol=1e-5, rtol=1e-5)

    print("KERNEL_OK")
</pallas_src>

<mosaic_0001>
module attributes {stable_mosaic.version = 11 : i64} {
  func.func @_disc_kernel(%arg0: i32, %arg1: memref<1x128x200xf32, #tpu.memory_space<vmem>>, %arg2: memref<1x200xf32, #tpu.memory_space<vmem>>, %arg3: memref<1xf32, #tpu.memory_space<smem>>, %arg4: memref<1x128xf32, #tpu.memory_space<vmem>>) attributes {dimension_semantics = [#tpu.dimension_semantics<parallel>], iteration_bounds = array<i64: 1>, scalar_prefetch = 0 : i64, scratch_operands = 0 : i64, tpu.core_type = #tpu.core_type<tc>, window_params = [{transform_indices = @transform_0, window_bounds = array<i64: 1, 128, 200>}, {pipeline_mode = #tpu.pipeline_mode<synchronous>, transform_indices = @transform_1, window_bounds = array<i64: 1, 200>}, {transform_indices = @transform_2, window_bounds = array<i64: 1>}, {transform_indices = @transform_3, window_bounds = array<i64: 1, 128>}]} {
    %c0 = arith.constant 0 : index
    %c0_0 = arith.constant 0 : index
    %c0_1 = arith.constant 0 : index
    %0 = vector.load %arg1[%c0, %c0_0, %c0_1] : memref<1x128x200xf32, #tpu.memory_space<vmem>>, vector<1x128x200xf32>
    %c0_2 = arith.constant 0 : index
    %c0_3 = arith.constant 0 : index
    %1 = vector.load %arg2[%c0_2, %c0_3] : memref<1x200xf32, #tpu.memory_space<vmem>>, vector<1x200xf32>
    %2 = vector.shape_cast %1 : vector<1x200xf32> to vector<1x1x200xf32>
    %3 = vector.broadcast %2 : vector<1x1x200xf32> to vector<1x128x200xf32>
    %4 = arith.mulf %0, %3 : vector<1x128x200xf32>
    %cst = arith.constant dense<0.000000e+00> : vector<1x128xf32>
    %5 = vector.multi_reduction <add>, %4, %cst [2] : vector<1x128x200xf32> to vector<1x128xf32>
    %c0_4 = arith.constant 0 : index
    %6 = memref.load %arg3[%c0_4] : memref<1xf32, #tpu.memory_space<smem>>
    %7 = vector.broadcast %6 : f32 to vector<1x128xf32>
    %8 = arith.addf %5, %7 : vector<1x128xf32>
    %cst_5 = arith.constant 0.000000e+00 : f32
    %9 = vector.broadcast %cst_5 : f32 to vector<1x128xf32>
    %10 = arith.subf %9, %8 : vector<1x128xf32>
    %11 = math.exp %10 : vector<1x128xf32>
    %cst_6 = arith.constant 1.000000e+00 : f32
    %12 = vector.broadcast %cst_6 : f32 to vector<1x128xf32>
    %13 = arith.addf %12, %11 : vector<1x128xf32>
    %cst_7 = arith.constant 1.000000e+00 : f32
    %14 = vector.broadcast %cst_7 : f32 to vector<1x128xf32>
    %15 = arith.divf %14, %13 : vector<1x128xf32>
    %c0_8 = arith.constant 0 : index
    %c0_9 = arith.constant 0 : index
    %16 = vector.load %arg4[%c0_8, %c0_9] : memref<1x128xf32, #tpu.memory_space<vmem>>, vector<1x128xf32>
    tpu.vector_store %arg4[%c0_8, %c0_9], %15 {strides = array<i32>} : memref<1x128xf32, #tpu.memory_space<vmem>>, vector<1x128xf32>,
    return
  }
  func.func @transform_0(%arg0: i32) -> (i32, i32, i32) {
    %c0_i32 = arith.constant 0 : i32
    %c0_i32_0 = arith.constant 0 : i32
    %c0_i32_1 = arith.constant 0 : i32
    return %arg0, %c0_i32, %c0_i32_0 : i32, i32, i32
  }
  func.func @transform_1(%arg0: i32) -> (i32, i32) {
    %c0_i32 = arith.constant 0 : i32
    %c0_i32_0 = arith.constant 0 : i32
    %c0_i32_1 = arith.constant 0 : i32
    return %c0_i32, %c0_i32_0 : i32, i32
  }
  func.func @transform_2(%arg0: i32) -> i32 {
    %c0_i32 = arith.constant 0 : i32
    %c0_i32_0 = arith.constant 0 : i32
    return %c0_i32 : i32
  }
  func.func @transform_3(%arg0: i32) -> (i32, i32) {
    %c0_i32 = arith.constant 0 : i32
    %c0_i32_0 = arith.constant 0 : i32
    return %arg0, %c0_i32 : i32, i32
  }
}

</mosaic_0001>

<bundles_post_ra>
// kernel: tpu_custom_call.1
= control target key start
LH: loop header
LB: loop body
LE: loop exit
PB: predicated region body
PF: predicated region fallthrough
CT: control target
= control target key end

     0   :  { %v50_v0 = vlaneseq  ;;  %vm92_vm0 = vcmask 588800   ;;  %s753_s0 = inlined_call_operand.vmem [shape: f32[1,128,200], index: 0, kind: input, shape index: {}]   ;;  %s754_s1 = inlined_call_operand.vmem [shape: f32[1,200], index: 1, kind: input, shape index: {}]   ;;  %s755_s2 = inlined_call_operand.<no memory space> [shape: f32[1], index: 2, kind: input, shape index: {}]   ;;  %s756_s3 = inlined_call_operand.hbm [shape: f32[1,128], index: 3, kind: output, shape index: {}]  }
   0x1   :  { %v48_v2 = vld [vmem:[%s754_s1] sm:$0x3]  ;;  %v17_v4 = vld [vmem:[%s753_s0 + $0x8] sm:$0xff]  ;;  %v18_v9 = vld [vmem:[%s753_s0 + $0x10] sm:$0xff] }
   0x2   :  { %v525_v1 = vshrl.u32 %v50_v0, 7  ;;  %v16_v3 = vld [vmem:[%s753_s0] sm:$0xff]  ;;  %v21_v8 = vld [vmem:[%s753_s0 + $0x28] sm:$0xff]  ;;  %v19_v12 = vld [vmem:[%s753_s0 + $0x18] sm:$0xff] }
   0x3   :  { %v20_v7 = vld [vmem:[%s753_s0 + $0x20] sm:$0xff]  ;;  %v22_v13 = vld [vmem:[%s753_s0 + $0x30] sm:$0xff]  ;;  %v23_v14 = vld [vmem:[%s753_s0 + $0x38] sm:$0xff] }
   0x4   :  { %v52_v5 = vsub.s32 0, %v525_v1  ;;  %v56_v6 = vsub.s32 1, %v525_v1  ;;  %v25_v15 = vld [vmem:[%s753_s0 + $0x48] sm:$0xff]  ;;  %v24_v24 = vld [vmem:[%s753_s0 + $0x40] sm:$0xff]  ;;  %v26_v28 = vld [vmem:[%s753_s0 + $0x50] sm:$0xff] }
   0x5   :  { %v27_v29 = vld [vmem:[%s753_s0 + $0x58] sm:$0xff]  ;;  %v29_v34 = vld [vmem:[%s753_s0 + $0x68] sm:$0xff] }
   0x6   :  { %v547_v10 = vrot.slane %v48_v2, %v52_v5  ;;  %v549_v11 = vrot.slane %v48_v2, %v56_v6  ;;  %v31_v35 = vld [vmem:[%s753_s0 + $0x78] sm:$0xff] }
   0x8   :  { %v60_v16 = vmul.f32 %v547_v10, %v16_v3  ;;  %v61_v17 = vmul.f32 %v549_v11, %v17_v4  ;;  %v64_v18 = vmul.f32 %v547_v10, %v20_v7  ;;  %v65_v19 = vmul.f32 %v549_v11, %v21_v8 }
   0x9   :  { %v62_v20 = vmul.f32 %v547_v10, %v18_v9  ;;  %v63_v21 = vmul.f32 %v549_v11, %v19_v12  ;;  %v66_v22 = vmul.f32 %v547_v10, %v22_v13  ;;  %v67_v23 = vmul.f32 %v549_v11, %v23_v14 }
   0xa   :  { %v93_v25 = vsel %vm92_vm0, %v61_v17, 0.0  ;;  %v101_v26 = vsel %vm92_vm0, %v65_v19, 0.0  ;;  %v69_v27 = vmul.f32 %v549_v11, %v25_v15 }
   0xb   :  { %v94_v30 = vadd.f32 %v93_v25, %v60_v16  ;;  %v102_v31 = vadd.f32 %v101_v26, %v64_v18  ;;  %v97_v32 = vsel %vm92_vm0, %v63_v21, 0.0  ;;  %v105_v33 = vsel %vm92_vm0, %v67_v23, 0.0 }
   0xc   :  { %9 = vsyncpa [#allocation4], 0  ;;  %v98_v36 = vadd.f32 %v97_v32, %v62_v20  ;;  %v68_v37 = vmul.f32 %v547_v10, %v24_v24  ;;  %v106_v38 = vadd.f32 %v105_v33, %v66_v22  ;;  %v109_v39 = vsel %vm92_vm0, %v69_v27, 0.0  ;;  %v28_v42 = vld [vmem:[%s753_s0 + $0x60] sm:$0xff]  ;;  %v30_v44 = vld [vmem:[%s753_s0 + $0x70] sm:$0xff] }
   0xd   :  { %95 = vadd.xlane.f32.xlu0 %v94_v30  ;;  %103 = vadd.xlane.f32.xlu1 %v102_v31  ;;  %v70_v40 = vmul.f32 %v547_v10, %v26_v28  ;;  %v71_v41 = vmul.f32 %v549_v11, %v27_v29  ;;  %v73_v43 = vmul.f32 %v549_v11, %v29_v34  ;;  %v33_v47 = vld [vmem:[%s753_s0 + $0x88] sm:$0xff]  ;;  %v35_v48 = vld [vmem:[%s753_s0 + $0x98] sm:$0xff]  ;;  %v32_v53 = vld [vmem:[%s753_s0 + $0x80] sm:$0xff]  ;;  %vm298_vm1 = vcmask 130112  }
   0xe   :  { %v75_v45 = vmul.f32 %v549_v11, %v31_v35  ;;  %v110_v49 = vadd.f32 %v109_v39, %v68_v37  ;;  %v72_v51 = vmul.f32 %v547_v10, %v28_v42  ;;  %v74_v52 = vmul.f32 %v547_v10, %v30_v44  ;;  %v34_v57 = vld [vmem:[%s753_s0 + $0x90] sm:$0xff]  ;;  %v37_v59 = vld [vmem:[%s753_s0 + $0xa8] sm:$0xff]  ;;  %v39_v60 = vld [vmem:[%s753_s0 + $0xb8] sm:$0xff] }
   0xf   :  { %v113_v46 = vsel %vm92_vm0, %v71_v41, 0.0  ;;  %v117_v54 = vsel %vm92_vm0, %v73_v43, 0.0  ;;  %v77_v56 = vmul.f32 %v549_v11, %v33_v47  ;;  %v79_v58 = vmul.f32 %v549_v11, %v35_v48  ;;  %v36_v3 = vld [vmem:[%s753_s0 + $0xa0] sm:$0xff]  ;;  %v38_v7 = vld [vmem:[%s753_s0 + $0xb0] sm:$0xff]  ;;  %v41_v9 = vld [vmem:[%s753_s0 + $0xc8] sm:$0xff] }
  0x10   :  { %v114_v50 = vadd.f32 %v113_v46, %v70_v40  ;;  %v121_v55 = vsel %vm92_vm0, %v75_v45, 0.0  ;;  %v76_v61 = vmul.f32 %v547_v10, %v32_v53  ;;  %v118_v62 = vadd.f32 %v117_v54, %v72_v51  ;;  %v43_v12 = vld [vmem:[%s753_s0 + $0xd8] sm:$0xff]  ;;  %v40_v17 = vld [vmem:[%s753_s0 + $0xc0] sm:$0xff]  ;;  %v42_v21 = vld [vmem:[%s753_s0 + $0xd0] sm:$0xff] }
  0x11   :  { %99 = vadd.xlane.f32.xlu0 %v98_v36  ;;  %107 = vadd.xlane.f32.xlu1 %v106_v38  ;;  %v122_v63 = vadd.f32 %v121_v55, %v74_v52  ;;  %v78_v2 = vmul.f32 %v547_v10, %v34_v57  ;;  %v125_v4 = vsel %vm92_vm0, %v77_v56, 0.0  ;;  %v129_v5 = vsel %vm92_vm0, %v79_v58, 0.0  ;;  %v45_v23 = vld [vmem:[%s753_s0 + $0xe8] sm:$0xff]  ;;  %v47_v24 = vld [vmem:[%s753_s0 + $0xf8] sm:$0xff]  ;;  %v44_v29 = vld [vmem:[%s753_s0 + $0xe0] sm:$0xff] }
  0x12   :  { %v81_v6 = vmul.f32 %v549_v11, %v37_v59  ;;  %v83_v8 = vmul.f32 %v549_v11, %v39_v60  ;;  %v80_v13 = vmul.f32 %v547_v10, %v36_v3  ;;  %v126_v14 = vadd.f32 %v125_v4, %v76_v61  ;;  %v46_v33 = vld [vmem:[%s753_s0 + $0xf0] sm:$0xff] }
  0x13   :  { %v130_v15 = vadd.f32 %v129_v5, %v78_v2  ;;  %v82_v16 = vmul.f32 %v547_v10, %v38_v7  ;;  %v85_v20 = vmul.f32 %v549_v11, %v41_v9  ;;  %v87_v22 = vmul.f32 %v549_v11, %v43_v12 }
  0x14   :  { %v133_v18 = vsel %vm92_vm0, %v81_v6, 0.0  ;;  %v137_v19 = vsel %vm92_vm0, %v83_v8, 0.0  ;;  %v84_v25 = vmul.f32 %v547_v10, %v40_v17  ;;  %v86_v28 = vmul.f32 %v547_v10, %v42_v21 }
  0x15   :  { %111 = vadd.xlane.f32.xlu0 %v110_v49  ;;  %115 = vadd.xlane.f32.xlu1 %v114_v50  ;;  %v134_v26 = vadd.f32 %v133_v18, %v80_v13  ;;  %v138_v27 = vadd.f32 %v137_v19, %v82_v16  ;;  %v141_v30 = vsel %vm92_vm0, %v85_v20, 0.0  ;;  %v145_v31 = vsel %vm92_vm0, %v87_v22, 0.0 }
  0x16   :  { %v89_v32 = vmul.f32 %v549_v11, %v45_v23  ;;  %v91_v34 = vmul.f32 %v549_v11, %v47_v24  ;;  %v88_v35 = vmul.f32 %v547_v10, %v44_v29  ;;  %v142_v36 = vadd.f32 %v141_v30, %v84_v25 }
  0x17   :  { %v146_v37 = vadd.f32 %v145_v31, %v86_v28  ;;  %v90_v38 = vmul.f32 %v547_v10, %v46_v33  ;;  %v683_v11 = vstv %s755_s2  ;;  %v696_v24 = vand.u32 127, %v50_v0  ;;  %s503_s2 = smov [#allocation3]  }
  0x18   :  { %v149_v39 = vsel %vm92_vm0, %v89_v32, 0.0  ;;  %v153_v40 = vsel %vm92_vm0, %v91_v34, 0.0  ;;  %vm305_vm2 = vcmask 195712   ;;  %vm312_vm3 = vcmask 261312   ;;  %s406_s22 = sshll.u32 %s503_s2, 4  ;;  %s407_s22 = int_to_ptr.vmem [resolvable:$true] %s406_s22 }
  0x19   :  { %119 = vadd.xlane.f32.xlu0 %v118_v62  ;;  %123 = vadd.xlane.f32.xlu1 %v122_v63  ;;  %v150_v41 = vadd.f32 %v149_v39, %v88_v35  ;;  %v154_v42 = vadd.f32 %v153_v40, %v90_v38  ;;  %v300_v0 = vadd.s32 4294967280, %v696_v24  ;;  %vm319_vm4 = vcmask 326912   ;;  %s479_s23 = scalar_lea.vmem %s407_s22, 16  ;;  %s483_s24 = scalar_lea.vmem %s407_s22, 32 }
  0x1a   :  { %vm326_vm5 = vcmask 392512   ;;  %vm333_vm6 = vcmask 458112   ;;  %vm340_vm7 = vcmask 523712   ;;  %vm347_vm8 = vcmask 589312   ;;  %p480_p0 = scmp.ne.s32.totalorder %s407_s22, %s479_s23  ;;  %p484_p1 = scmp.lt.s32.totalorder %s407_s22, %s407_s22 }
  0x1b   :  { %vm354_vm9 = vcmask 654912   ;;  %vm361_vm10 = vcmask 720512   ;;  %vm368_vm11 = vcmask 786112   ;;  %vm375_vm12 = vcmask 851712   ;;  %p485_p2 = scmp.lt.s32.totalorder %s483_s24, %s479_s23 }
  0x1c   :  { %vm382_vm13 = vcmask 917312   ;;  %vm389_vm14 = vcmask 982912   ;;  %vm396_vm15 = vcmask 1048512  }
  0x1d   :  { %127 = vadd.xlane.f32.xlu0 %v126_v14  ;;  %131 = vadd.xlane.f32.xlu1 %v130_v15  ;;  %p486_p3 = por %p485_p2, %p484_p1 }
  0x1f   :  { %p487_p4 = pnand %p486_p3, %p480_p0 }
  0x21   :  { %135 = vadd.xlane.f32.xlu0 %v134_v26  ;;  %139 = vadd.xlane.f32.xlu1 %v138_v27 }
  0x25   :  { %143 = vadd.xlane.f32.xlu0 %v142_v36  ;;  %147 = vadd.xlane.f32.xlu1 %v146_v37 }
  0x29   :  { %151 = vadd.xlane.f32.xlu0 %v150_v41  ;;  %155 = vadd.xlane.f32.xlu1 %v154_v42 }
  0x9a   :  { %v96_v43 = vpop.xlane.xlu0 %95  ;;  %v104_v44 = vpop.xlane.xlu1 %103 }
  0x9b   :  { %v159_v45 = vadd.f32 %v683_v11, %v96_v43  ;;  %v161_v10 = vadd.f32 %v683_v11, %v104_v44  ;;  %v293_v44 = vadd.s32 4294967288, %v696_v24 }
  0x9d   :  { %v175_v46 = vsub.f32 0.0, %v159_v45  ;;  %v177_v47 = vsub.f32 0.0, %v161_v10 }
  0x9e   :  { %v100_v48 = vpop.xlane.xlu0 %99  ;;  %v108_v49 = vpop.xlane.xlu1 %107 }
  0x9f   :  { %v191_v50 = vmul.f32 1.442695, %v175_v46  ;;  %v195_v51 = vmul.f32 1.442695, %v177_v47  ;;  %v160_v52 = vadd.f32 %v683_v11, %v100_v48  ;;  %v162_v53 = vadd.f32 %v683_v11, %v108_v49 }
  0xa0   :  { %v291_v49 = vsub.s32 %v696_v24, %v525_v1 }
  0xa1   :  { %415 = vpow2.f32 %v191_v50  ;;  %v176_v54 = vsub.f32 0.0, %v160_v52  ;;  %v178_v55 = vsub.f32 0.0, %v162_v53  ;;  %v303_v50 = vsub.s32 %v300_v0, %v525_v1 }
  0xa2   :  { %417 = vpow2.f32 %v195_v51  ;;  %v112_v56 = vpop.xlane.xlu0 %111  ;;  %v116_v57 = vpop.xlane.xlu1 %115  ;;  %v307_v51 = vadd.s32 4294967272, %v696_v24 }
  0xa3   :  { %v193_v58 = vmul.f32 1.442695, %v176_v54  ;;  %v197_v59 = vmul.f32 1.442695, %v178_v55  ;;  %v163_v60 = vadd.f32 %v683_v11, %v112_v56  ;;  %v164_v61 = vadd.f32 %v683_v11, %v116_v57 }
  0xa5   :  { %419 = vpow2.f32 %v193_v58  ;;  %v179_v62 = vsub.f32 0.0, %v163_v60  ;;  %v180_v63 = vsub.f32 0.0, %v164_v61 }
  0xa6   :  { %421 = vpow2.f32 %v197_v59  ;;  %v120_v2 = vpop.xlane.xlu0 %119  ;;  %v124_v3 = vpop.xlane.xlu1 %123  ;;  %v314_v59 = vadd.s32 4294967264, %v696_v24 }
  0xa7   :  { %v199_v4 = vmul.f32 1.442695, %v179_v62  ;;  %v201_v5 = vmul.f32 1.442695, %v180_v63  ;;  %v165_v6 = vadd.f32 %v683_v11, %v120_v2  ;;  %v166_v7 = vadd.f32 %v683_v11, %v124_v3 }
  0xa8   :  { %v296_v63 = vsub.s32 %v293_v44, %v525_v1 }
  0xa9   :  { %423 = vpow2.f32 %v199_v4  ;;  %v181_v8 = vsub.f32 0.0, %v165_v6  ;;  %v182_v9 = vsub.f32 0.0, %v166_v7  ;;  %v310_v4 = vsub.s32 %v307_v51, %v525_v1 }
  0xaa   :  { %425 = vpow2.f32 %v201_v5  ;;  %v128_v12 = vpop.xlane.xlu0 %127  ;;  %v132_v13 = vpop.xlane.xlu1 %131  ;;  %v321_v5 = vadd.s32 4294967256, %v696_v24 }
  0xab   :  { %v416_v14 = vpop.eup %415  ;;  %v203_v15 = vmul.f32 1.442695, %v181_v8  ;;  %v167_v16 = vadd.f32 %v683_v11, %v128_v12  ;;  %v168_v17 = vadd.f32 %v683_v11, %v132_v13  ;;  %v205_v20 = vmul.f32 1.442695, %v182_v9 }
  0xac   :  { %v418_v18 = vpop.eup %417  ;;  %v223_v19 = vadd.f32 1.0, %v416_v14 }
  0xad   :  { %v225_v21 = vadd.f32 1.0, %v418_v18  ;;  %427 = vpow2.f32 %v203_v15  ;;  %v183_v22 = vsub.f32 0.0, %v167_v16  ;;  %v184_v23 = vsub.f32 0.0, %v168_v17 }
  0xae   :  { %429 = vrcp.f32 %v223_v19  ;;  %v136_v25 = vpop.xlane.xlu0 %135  ;;  %v140_v26 = vpop.xlane.xlu1 %139  ;;  %v328_v18 = vadd.s32 4294967248, %v696_v24 }
  0xaf   :  { %v420_v27 = vpop.eup %419  ;;  %431 = vrcp.f32 %v225_v21  ;;  %v207_v28 = vmul.f32 1.442695, %v183_v22  ;;  %v169_v29 = vadd.f32 %v683_v11, %v136_v25  ;;  %v209_v32 = vmul.f32 1.442695, %v184_v23 }
  0xb0   :  { %v422_v30 = vpop.eup %421  ;;  %v224_v31 = vadd.f32 1.0, %v420_v27  ;;  %433 = vpow2.f32 %v205_v20  ;;  %v170_v33 = vadd.f32 %v683_v11, %v140_v26  ;;  %v324_v22 = vsub.s32 %v321_v5, %v525_v1 }
  0xb1   :  { %v226_v34 = vadd.f32 1.0, %v422_v30  ;;  %435 = vpow2.f32 %v207_v28  ;;  %v185_v35 = vsub.f32 0.0, %v169_v29  ;;  %v335_v26 = vadd.s32 4294967240, %v696_v24 }
  0xb2   :  { %437 = vrcp.f32 %v224_v31  ;;  %v186_v36 = vsub.f32 0.0, %v170_v33  ;;  %v144_v37 = vpop.xlane.xlu0 %143  ;;  %v148_v38 = vpop.xlane.xlu1 %147  ;;  %v342_v30 = vadd.s32 4294967232, %v696_v24  ;;  %v377_v5 = vadd.s32 4294967192, %v696_v24 }
  0xb3   :  { %v424_v39 = vpop.eup %423  ;;  %439 = vrcp.f32 %v226_v34  ;;  %v211_v40 = vmul.f32 1.442695, %v185_v35  ;;  %v171_v41 = vadd.f32 %v683_v11, %v144_v37  ;;  %v172_v42 = vadd.f32 %v683_v11, %v148_v38 }
  0xb4   :  { %v426_v43 = vpop.eup %425  ;;  %v227_v45 = vadd.f32 1.0, %v424_v39  ;;  %441 = vpow2.f32 %v209_v32  ;;  %v213_v10 = vmul.f32 1.442695, %v186_v36  ;;  %v331_v34 = vsub.s32 %v328_v18, %v525_v1 }
  0xb5   :  { %v228_v46 = vadd.f32 1.0, %v426_v43  ;;  %443 = vpow2.f32 %v211_v40  ;;  %v187_v47 = vsub.f32 0.0, %v171_v41  ;;  %v188_v48 = vsub.f32 0.0, %v172_v42 }
  0xb6   :  { %445 = vrcp.f32 %v227_v45  ;;  %v152_v52 = vpop.xlane.xlu0 %151  ;;  %v156_v53 = vpop.xlane.xlu1 %155  ;;  %v338_v37 = vsub.s32 %v335_v26, %v525_v1  ;;  %v345_v41 = vsub.s32 %v342_v30, %v525_v1  ;;  %v349_v42 = vadd.s32 4294967224, %v696_v24 }
  0xb7   :  { %v428_v54 = vpop.eup %427  ;;  %447 = vrcp.f32 %v228_v46  ;;  %v215_v55 = vmul.f32 1.442695, %v187_v47  ;;  %v217_v56 = vmul.f32 1.442695, %v188_v48  ;;  %v173_v57 = vadd.f32 %v683_v11, %v152_v52 }
  0xb8   :  { %v430_v58 = vpop.eup %429  ;;  %v229_v60 = vadd.f32 1.0, %v428_v54  ;;  %449 = vpow2.f32 %v213_v10  ;;  %v174_v61 = vadd.f32 %v683_v11, %v156_v53  ;;  %v317_v11 = vsub.s32 %v314_v59, %v525_v1 }
  0xb9   :  { %v432_v62 = vpop.eup %431  ;;  %451 = vpow2.f32 %v215_v55  ;;  %v189_v2 = vsub.f32 0.0, %v173_v57  ;;  %v292_v16 = vrot.slane %v430_v58, %v291_v49  ;;  %v356_v46 = vadd.s32 4294967216, %v696_v24 }
  0xba   :  { %v434_v3 = vpop.eup %433  ;;  %453 = vrcp.f32 %v229_v60  ;;  %v190_v6 = vsub.f32 0.0, %v174_v61  ;;  %v304_v20 = vrot.slane %v432_v62, %v303_v50  ;;  %v363_v49 = vadd.s32 4294967208, %v696_v24 }
  0xbb   :  { %v436_v7 = vpop.eup %435  ;;  %v230_v8 = vadd.f32 1.0, %v434_v3  ;;  %455 = vpow2.f32 %v217_v56  ;;  %v219_v9 = vmul.f32 1.442695, %v189_v2  ;;  %v352_v53 = vsub.s32 %v349_v42, %v525_v1 }
  0xbc   :  { %v438_v12 = vpop.eup %437  ;;  %v231_v13 = vadd.f32 1.0, %v436_v7  ;;  %v221_v14 = vmul.f32 1.442695, %v190_v6  ;;  %v359_v57 = vsub.s32 %v356_v46, %v525_v1  ;;  %v370_v58 = vadd.s32 4294967200, %v696_v24 }
  0xbd   :  { %v440_v15 = vpop.eup %439  ;;  %v297_v17 = vrot.slane %v438_v12, %v296_v63  ;;  %457 = vrcp.f32 %v230_v8  ;;  %v366_v63 = vsub.s32 %v363_v49, %v525_v1  ;;  %v384_v12 = vadd.s32 4294967184, %v696_v24 }
  0xbe   :  { %v442_v19 = vpop.eup %441  ;;  %v311_v21 = vrot.slane %v440_v15, %v310_v4  ;;  %459 = vrcp.f32 %v231_v13  ;;  %v373_v8 = vsub.s32 %v370_v58, %v525_v1  ;;  %v380_v15 = vsub.s32 %v377_v5, %v525_v1 }
  0xbf   :  { %v444_v23 = vpop.eup %443  ;;  %v299_v25 = vsel %vm298_vm1, %v297_v17, %v292_v16  ;;  %v232_v27 = vadd.f32 1.0, %v442_v19  ;;  %461 = vpow2.f32 %v219_v9  ;;  %v391_v16 = vadd.s32 4294967176, %v696_v24 }
  0xc0   :  { %v446_v28 = vpop.eup %445  ;;  %v306_v29 = vsel %vm305_vm2, %v304_v20, %v299_v25  ;;  %v233_v31 = vadd.f32 1.0, %v444_v23  ;;  %463 = vpow2.f32 %v221_v14  ;;  %v387_v20 = vsub.s32 %v384_v12, %v525_v1 }
  0xc1   :  { %v448_v32 = vpop.eup %447  ;;  %v318_v33 = vrot.slane %v446_v28, %v317_v11  ;;  %465 = vrcp.f32 %v232_v27  ;;  %v313_v0 = vsel %vm312_vm3, %v311_v21, %v306_v29  ;;  %v394_v23 = vsub.s32 %v391_v16, %v525_v1 }
  0xc2   :  { %v450_v35 = vpop.eup %449  ;;  %467 = vrcp.f32 %v233_v31  ;;  %v325_v40 = vrot.slane %v448_v32, %v324_v22 }
  0xc3   :  { %v452_v36 = vpop.eup %451  ;;  %v234_v38 = vadd.f32 1.0, %v450_v35  ;;  %v320_v45 = vsel %vm319_vm4, %v318_v33, %v313_v0 }
  0xc4   :  { %v454_v39 = vpop.eup %453  ;;  %v235_v43 = vadd.f32 1.0, %v452_v36  ;;  %v327_v51 = vsel %vm326_vm5, %v325_v40, %v320_v45 }
  0xc5   :  { %v456_v44 = vpop.eup %455  ;;  %v332_v10 = vrot.slane %v454_v39, %v331_v34  ;;  %469 = vrcp.f32 %v234_v38 }
  0xc6   :  { %471 = vrcp.f32 %v235_v43  ;;  %v236_v47 = vadd.f32 1.0, %v456_v44 }
  0xc7   :  { %v458_v48 = vpop.eup %457  ;;  %v334_v55 = vsel %vm333_vm6, %v332_v10, %v327_v51 }
  0xc8   :  { %v460_v50 = vpop.eup %459  ;;  %v339_v52 = vrot.slane %v458_v48, %v338_v37  ;;  %473 = vrcp.f32 %v236_v47 }
  0xc9   :  { %v462_v54 = vpop.eup %461  ;;  %v346_v56 = vrot.slane %v460_v50, %v345_v41 }
  0xca   :  { %v464_v59 = vpop.eup %463  ;;  %v237_v60 = vadd.f32 1.0, %v462_v54  ;;  %v341_v4 = vsel %vm340_vm7, %v339_v52, %v334_v55 }
  0xcb   :  { %v466_v61 = vpop.eup %465  ;;  %v238_v62 = vadd.f32 1.0, %v464_v59  ;;  %v348_v7 = vsel %vm347_vm8, %v346_v56, %v341_v4 }
  0xcc   :  { %v468_v2 = vpop.eup %467  ;;  %v353_v3 = vrot.slane %v466_v61, %v352_v53  ;;  %475 = vrcp.f32 %v237_v60 }
  0xcd   :  { %v360_v6 = vrot.slane %v468_v2, %v359_v57  ;;  %477 = vrcp.f32 %v238_v62 }
  0xce   :  { %v355_v13 = vsel %vm354_vm9, %v353_v3, %v348_v7 }
  0xcf   :  { %v470_v9 = vpop.eup %469  ;;  %v362_v17 = vsel %vm361_vm10, %v360_v6, %v355_v13 }
  0xd0   :  { %v472_v11 = vpop.eup %471  ;;  %v367_v14 = vrot.slane %v470_v9, %v366_v63 }
  0xd1   :  { %v374_v18 = vrot.slane %v472_v11, %v373_v8 }
  0xd2   :  { %v474_v19 = vpop.eup %473  ;;  %v369_v21 = vsel %vm368_vm11, %v367_v14, %v362_v17 }
  0xd3   :  { %v381_v22 = vrot.slane %v474_v19, %v380_v15  ;;  %v376_v25 = vsel %vm375_vm12, %v374_v18, %v369_v21 }
  0xd5   :  { %v383_v24 = vsel %vm382_vm13, %v381_v22, %v376_v25 }
  0xd6   :  { %v476_v26 = vpop.eup %475 }
  0xd7   :  { %v478_v27 = vpop.eup %477  ;;  %v388_v28 = vrot.slane %v476_v26, %v387_v20 }
  0xd8   :  { %v395_v29 = vrot.slane %v478_v27, %v394_v23 }
  0xd9   :  { %v390_v30 = vsel %vm389_vm14, %v388_v28, %v383_v24 }
  0xda   :  { %v397_v31 = vsel %vm396_vm15, %v395_v29, %v390_v30 }
  0xdb   :  { %399 = vst [vmem:[#allocation3] sm:$0x1] %v397_v31 }
  0xdc   :  { %490 = shalt.err (!%p487_p4)
}
  0xdd   :  { %s491_s27 = scalar_lea.hbm %s756_s3, 16 }
  0xde   :  { %p492_p5 = scmp.ne.s32.totalorder %s756_s3, %s491_s27  ;;  %p495_p6 = scmp.lt.u32.totalorder %s491_s27, %s756_s3 }
  0xe0   :  { %p497_p7 = pnand %p495_p6, %p492_p5 }
  0xe2   :  { %500 = shalt.err (!%p497_p7)
}
  0xe3   :  { %409 = dma.vmem_to_hbm [thread:$0]  %s407_s22, 16, %s756_s3, [#allocation4]  }
  0xe4   :  { %501 = dma.done.wait [#allocation4], 16  }
  0xe5   :  { %502 = vsyncadd [#allocation4], 4294967280 }
  0xe6   :  { %413 = vsyncpa [#allocation4], 1 }

</bundles_post_ra>
